<compile_context>
chip_gen: v7x
topology: tpu7x:2x2x1
jax: 0.10.0
libtpu: 0.0.40
codegen_flags: <defaults>
</compile_context>

<pallas_src>
import functools
import math

import jax
import jax.numpy as jnp
from jax.experimental import pallas as pl
from jax.experimental.pallas import tpu as pltpu


_MIN_NORM = 1e-15          # geoopt-style clamp on norms / denominators
_ATANH_CLAMP = 1.0 - 1e-7  # keep artanh argument strictly inside (-1, 1) in f32
_BALL_EPS = 1e-5           # projx boundary margin (matches the f64 module's eps)


def _round_up(v, m):
    return (v + m - 1) // m * m


def _hyp_linear_kernel(x_ref, wt_ref, b_ref, o_ref, *, c):
    """One M-tile of the fused HypLinear forward.

    x_ref : (tm, Kp) f32   input rows (zero padded in K and in M)
    wt_ref: (Kp, Np) f32   W^T, zero padded (VMEM-resident across the grid)
    b_ref : (1,  Np) f32   Euclidean bias, zero padded (all-zero when bias=None)
    o_ref : (tm, Np) f32   output rows
    """
    sqrt_c = c ** 0.5
    x = x_ref[...]

    # ---- mobius_matvec(W, x): MXU matmul + row-wise hyperbolic rescale -------
    mx = jnp.dot(x, wt_ref[...], preferred_element_type=jnp.float32)      # (tm, Np)
    x_norm = jnp.sqrt(
        jnp.maximum(jnp.sum(x * x, axis=-1, keepdims=True), _MIN_NORM * _MIN_NORM))
    mx_sq = jnp.sum(mx * mx, axis=-1, keepdims=True)
    mx_norm = jnp.sqrt(jnp.maximum(mx_sq, _MIN_NORM * _MIN_NORM))
    a = jnp.minimum(sqrt_c * x_norm, _ATANH_CLAMP)
    artanh_xn = 0.5 * jnp.log((1.0 + a) / (1.0 - a))                      # artanh
    res_c = jnp.tanh(mx_norm / x_norm * artanh_xn) * mx / (mx_norm * sqrt_c)
    mv = jnp.where(mx_sq == 0.0, 0.0, res_c)

    # ---- bias: expmap0(b) then mobius_add(mv, b_h) ---------------------------
    # (With b == 0 this reduces exactly to mv, so the bias=None case reuses it.)
    b = b_ref[...]
    b_norm = jnp.sqrt(
        jnp.maximum(jnp.sum(b * b, axis=-1, keepdims=True), _MIN_NORM * _MIN_NORM))
    b_h = jnp.tanh(sqrt_c * b_norm) * b / (sqrt_c * b_norm)               # expmap0

    x2 = jnp.sum(mv * mv, axis=-1, keepdims=True)
    y2 = jnp.sum(b_h * b_h, axis=-1, keepdims=True)
    xy = jnp.sum(mv * b_h, axis=-1, keepdims=True)
    num = (1.0 + 2.0 * c * xy + c * y2) * mv + (1.0 - c * x2) * b_h
    den = 1.0 + 2.0 * c * xy + c * c * x2 * y2
    res = num / jnp.maximum(den, _MIN_NORM)

    # ---- projx: clip back onto the open ball ---------------------------------
    r_norm = jnp.sqrt(
        jnp.maximum(jnp.sum(res * res, axis=-1, keepdims=True), _MIN_NORM * _MIN_NORM))
    maxnorm = (1.0 - _BALL_EPS) / sqrt_c
    o_ref[...] = jnp.where(r_norm > maxnorm, res / r_norm * maxnorm, res)


def hyp_linear(x, weight, bias=None, *, c=1.0):
    """Pallas TPU forward of HypLinear.

    x:      (..., in_features)
    weight: (out_features, in_features)   (PyTorch layout)
    bias:   (out_features,) or None
    """
    x = x.astype(jnp.float32)
    weight = weight.astype(jnp.float32)
    out_f, in_f = weight.shape

    lead = x.shape[:-1]
    M = math.prod(lead) if lead else 1
    x2d = x.reshape(M, in_f)

    # TPU-friendly padded shapes (zero padding is numerically exact here).
    Kp = _round_up(in_f, 128)            # MXU-aligned contraction
    Np = _round_up(out_f, 128)           # lane-dense output stores
    tm = min(256, _round_up(M, 8))       # sublane-aligned M tile, VMEM-safe on v7x
    Mp = _round_up(M, tm)

    x_p = jnp.zeros((Mp, Kp), jnp.float32).at[:M, :in_f].set(x2d)
    wt_p = jnp.zeros((Kp, Np), jnp.float32).at[:in_f, :out_f].set(weight.T)
    if bias is None:
        b_p = jnp.zeros((1, Np), jnp.float32)
    else:
        b_p = jnp.zeros((1, Np), jnp.float32).at[0, :out_f].set(bias.astype(jnp.float32))

    grid = (Mp // tm,)
    cost = pl.CostEstimate(
        flops=2 * Mp * Kp * Np,
        transcendentals=8 * Mp,
        bytes_accessed=4 * (Mp * Kp + Kp * Np + Np + Mp * Np),
    )

    out_p = pl.pallas_call(
        functools.partial(_hyp_linear_kernel, c=float(c)),
        out_shape=jax.ShapeDtypeStruct((Mp, Np), jnp.float32),
        grid=grid,
        in_specs=[
            pl.BlockSpec((tm, Kp), lambda i: (i, 0)),
            pl.BlockSpec((Kp, Np), lambda i: (0, 0)),   # W^T: constant block -> stays resident
            pl.BlockSpec((1, Np), lambda i: (0, 0)),    # bias: constant block -> stays resident
        ],
        out_specs=pl.BlockSpec((tm, Np), lambda i: (i, 0)),
        compiler_params=pltpu.CompilerParams(
            dimension_semantics=("parallel",),          # megacore-shardable M axis
        ),
        cost_estimate=cost,
    )(x_p, wt_p, b_p)

    return out_p[:M, :out_f].reshape(*lead, out_f)


def _ref_forward(x, weight, bias, c=1.0):
    """Plain-JAX reference implementing the same geoopt-style formulas."""
    sqrt_c = c ** 0.5
    x = x.astype(jnp.float32)
    W = weight.astype(jnp.float32)

    x_norm = jnp.maximum(jnp.linalg.norm(x, axis=-1, keepdims=True), _MIN_NORM)
    mx = x @ W.T
    mx_norm = jnp.maximum(jnp.linalg.norm(mx, axis=-1, keepdims=True), _MIN_NORM)
    a = jnp.minimum(sqrt_c * x_norm, _ATANH_CLAMP)
    artanh_xn = 0.5 * jnp.log((1.0 + a) / (1.0 - a))
    res_c = jnp.tanh(mx_norm / x_norm * artanh_xn) * mx / (mx_norm * sqrt_c)
    mv = jnp.where(jnp.sum(mx * mx, axis=-1, keepdims=True) == 0.0, 0.0, res_c)

    if bias is not None:
        b = bias.astype(jnp.float32)
        b_norm = jnp.maximum(jnp.linalg.norm(b), _MIN_NORM)
        b_h = jnp.tanh(sqrt_c * b_norm) * b / (sqrt_c * b_norm)
        x2 = jnp.sum(mv * mv, axis=-1, keepdims=True)
        y2 = jnp.sum(b_h * b_h)
        xy = jnp.sum(mv * b_h, axis=-1, keepdims=True)
        num = (1.0 + 2.0 * c * xy + c * y2) * mv + (1.0 - c * x2) * b_h
        den = 1.0 + 2.0 * c * xy + c * c * x2 * y2
        mv = num / jnp.maximum(den, _MIN_NORM)

    norm = jnp.maximum(jnp.linalg.norm(mv, axis=-1, keepdims=True), _MIN_NORM)
    maxnorm = (1.0 - _BALL_EPS) / sqrt_c
    return jnp.where(norm > maxnorm, mv / norm * maxnorm, mv)


if __name__ == "__main__":
    in_features, out_features = 32, 16
    batch, seq = 2, 8
    c = 1.0

    key = jax.random.PRNGKey(0)
    k_w, k_b, k_x = jax.random.split(key, 3)

    # Deterministic parameter init mirroring kaiming/uniform bounds (f32 on TPU).
    bound = 1.0 / (in_features ** 0.5)
    weight = jax.random.uniform(k_w, (out_features, in_features), jnp.float32,
                                minval=-bound, maxval=bound)
    bias = jax.random.uniform(k_b, (out_features,), jnp.float32,
                              minval=-bound, maxval=bound)
    # Example inputs: points inside the unit Poincare ball (norm ~ 0.5).
    x = 0.1 * jax.random.normal(k_x, (batch, seq, in_features), jnp.float32)

    out = hyp_linear(x, weight, bias, c=c)
    out = jax.block_until_ready(out)

    ref = _ref_forward(x, weight, bias, c=c)
    assert out.shape == (batch, seq, out_features), out.shape
    assert bool(jnp.all(jnp.isfinite(out))), "non-finite output"
    max_err = float(jnp.max(jnp.abs(out - ref)))
    assert jnp.allclose(out, ref, atol=1e-4, rtol=1e-4), f"mismatch vs reference: {max_err}"

    print("KERNEL_OK")
</pallas_src>

<mosaic_0001>
module attributes {stable_mosaic.version = 11 : i64} {
  func.func @_hyp_linear_kernel(%arg0: i32, %arg1: memref<16x128xf32, #tpu.memory_space<vmem>>, %arg2: memref<128x128xf32, #tpu.memory_space<vmem>>, %arg3: memref<1x128xf32, #tpu.memory_space<vmem>>, %arg4: memref<16x128xf32, #tpu.memory_space<vmem>>) attributes {dimension_semantics = [#tpu.dimension_semantics<parallel>], iteration_bounds = array<i64: 1>, scalar_prefetch = 0 : i64, scratch_operands = 0 : i64, tpu.core_type = #tpu.core_type<tc>, window_params = [{transform_indices = @transform_0, window_bounds = array<i64: 16, 128>}, {pipeline_mode = #tpu.pipeline_mode<synchronous>, transform_indices = @transform_1, window_bounds = array<i64: 128, 128>}, {pipeline_mode = #tpu.pipeline_mode<synchronous>, transform_indices = @transform_2, window_bounds = array<i64: 1, 128>}, {transform_indices = @transform_3, window_bounds = array<i64: 16, 128>}]} {
    %c0 = arith.constant 0 : index
    %c0_0 = arith.constant 0 : index
    %0 = vector.load %arg1[%c0, %c0_0] : memref<16x128xf32, #tpu.memory_space<vmem>>, vector<16x128xf32>
    %c0_1 = arith.constant 0 : index
    %c0_2 = arith.constant 0 : index
    %1 = vector.load %arg2[%c0_1, %c0_2] : memref<128x128xf32, #tpu.memory_space<vmem>>, vector<128x128xf32>
    %cst = arith.constant dense<0.000000e+00> : vector<16x128xf32>
    %2 = tpu.matmul %0, %1, %cst {dimension_numbers = #tpu.dot_dimension_numbers<[1], [0], [0], [1], [0, 0, 1, 1], [], []>} : vector<16x128xf32>, vector<128x128xf32>, vector<16x128xf32> -> vector<16x128xf32>
    %3 = arith.mulf %0, %0 : vector<16x128xf32>
    %cst_3 = arith.constant dense<0.000000e+00> : vector<16xf32>
    %4 = vector.multi_reduction <add>, %3, %cst_3 [1] : vector<16x128xf32> to vector<16xf32>
    %5 = vector.shape_cast %4 : vector<16xf32> to vector<16x1xf32>
    %cst_4 = arith.constant 1.000000e-30 : f32
    %6 = vector.broadcast %cst_4 : f32 to vector<16x1xf32>
    %7 = arith.maximumf %5, %6 : vector<16x1xf32>
    %8 = math.sqrt %7 : vector<16x1xf32>
    %9 = arith.mulf %2, %2 : vector<16x128xf32>
    %cst_5 = arith.constant dense<0.000000e+00> : vector<16xf32>
    %10 = vector.multi_reduction <add>, %9, %cst_5 [1] : vector<16x128xf32> to vector<16xf32>
    %11 = vector.shape_cast %10 : vector<16xf32> to vector<16x1xf32>
    %cst_6 = arith.constant 1.000000e-30 : f32
    %12 = vector.broadcast %cst_6 : f32 to vector<16x1xf32>
    %13 = arith.maximumf %11, %12 : vector<16x1xf32>
    %14 = math.sqrt %13 : vector<16x1xf32>
    %cst_7 = arith.constant 1.000000e+00 : f32
    %15 = vector.broadcast %cst_7 : f32 to vector<16x1xf32>
    %16 = arith.mulf %15, %8 : vector<16x1xf32>
    %cst_8 = arith.constant 0.99999988 : f32
    %17 = vector.broadcast %cst_8 : f32 to vector<16x1xf32>
    %18 = arith.minimumf %16, %17 : vector<16x1xf32>
    %cst_9 = arith.constant 1.000000e+00 : f32
    %19 = vector.broadcast %cst_9 : f32 to vector<16x1xf32>
    %20 = arith.addf %19, %18 : vector<16x1xf32>
    %cst_10 = arith.constant 1.000000e+00 : f32
    %21 = vector.broadcast %cst_10 : f32 to vector<16x1xf32>
    %22 = arith.subf %21, %18 : vector<16x1xf32>
    %23 = arith.divf %20, %22 : vector<16x1xf32>
    %24 = math.log %23 : vector<16x1xf32>
    %cst_11 = arith.constant 5.000000e-01 : f32
    %25 = vector.broadcast %cst_11 : f32 to vector<16x1xf32>
    %26 = arith.mulf %25, %24 : vector<16x1xf32>
    %27 = arith.divf %14, %8 : vector<16x1xf32>
    %28 = arith.mulf %27, %26 : vector<16x1xf32>
    %29 = math.tanh %28 : vector<16x1xf32>
    %30 = vector.broadcast %29 : vector<16x1xf32> to vector<16x128xf32>
    %31 = arith.mulf %30, %2 : vector<16x128xf32>
    %cst_12 = arith.constant 1.000000e+00 : f32
    %32 = vector.broadcast %cst_12 : f32 to vector<16x1xf32>
    %33 = arith.mulf %14, %32 : vector<16x1xf32>
    %34 = vector.broadcast %33 : vector<16x1xf32> to vector<16x128xf32>
    %35 = arith.divf %31, %34 : vector<16x128xf32>
    %cst_13 = arith.constant 0.000000e+00 : f32
    %36 = vector.broadcast %cst_13 : f32 to vector<16x1xf32>
    %37 = arith.cmpf oeq, %11, %36 : vector<16x1xf32>
    %cst_14 = arith.constant 0.000000e+00 : f32
    %38 = vector.shape_cast %37 : vector<16x1xi1> to vector<16x1xi1>
    %39 = vector.broadcast %38 : vector<16x1xi1> to vector<16x128xi1>
    %40 = vector.broadcast %cst_14 : f32 to vector<16x128xf32>
    %41 = arith.select %39, %40, %35 : vector<16x128xi1>, vector<16x128xf32>
    %c0_15 = arith.constant 0 : index
    %c0_16 = arith.constant 0 : index
    %42 = vector.load %arg3[%c0_15, %c0_16] : memref<1x128xf32, #tpu.memory_space<vmem>>, vector<1x128xf32>
    %43 = arith.mulf %42, %42 : vector<1x128xf32>
    %cst_17 = arith.constant dense<0.000000e+00> : vector<1xf32>
    %44 = vector.multi_reduction <add>, %43, %cst_17 [1] : vector<1x128xf32> to vector<1xf32>
    %45 = vector.shape_cast %44 : vector<1xf32> to vector<1x1xf32>
    %cst_18 = arith.constant 1.000000e-30 : f32
    %46 = vector.broadcast %cst_18 : f32 to vector<1x1xf32>
    %47 = arith.maximumf %45, %46 : vector<1x1xf32>
    %48 = math.sqrt %47 : vector<1x1xf32>
    %cst_19 = arith.constant 1.000000e+00 : f32
    %49 = vector.broadcast %cst_19 : f32 to vector<1x1xf32>
    %50 = arith.mulf %49, %48 : vector<1x1xf32>
    %51 = math.tanh %50 : vector<1x1xf32>
    %52 = vector.broadcast %51 : vector<1x1xf32> to vector<1x128xf32>
    %53 = arith.mulf %52, %42 : vector<1x128xf32>
    %cst_20 = arith.constant 1.000000e+00 : f32
    %54 = vector.broadcast %cst_20 : f32 to vector<1x1xf32>
    %55 = arith.mulf %54, %48 : vector<1x1xf32>
    %56 = vector.broadcast %55 : vector<1x1xf32> to vector<1x128xf32>
    %57 = arith.divf %53, %56 : vector<1x128xf32>
    %58 = arith.mulf %41, %41 : vector<16x128xf32>
    %cst_21 = arith.constant dense<0.000000e+00> : vector<16xf32>
    %59 = vector.multi_reduction <add>, %58, %cst_21 [1] : vector<16x128xf32> to vector<16xf32>
    %60 = vector.shape_cast %59 : vector<16xf32> to vector<16x1xf32>
    %61 = arith.mulf %57, %57 : vector<1x128xf32>
    %cst_22 = arith.constant dense<0.000000e+00> : vector<1xf32>
    %62 = vector.multi_reduction <add>, %61, %cst_22 [1] : vector<1x128xf32> to vector<1xf32>
    %63 = vector.shape_cast %62 : vector<1xf32> to vector<1x1xf32>
    %64 = vector.broadcast %57 : vector<1x128xf32> to vector<16x128xf32>
    %65 = arith.mulf %41, %64 : vector<16x128xf32>
    %cst_23 = arith.constant dense<0.000000e+00> : vector<16xf32>
    %66 = vector.multi_reduction <add>, %65, %cst_23 [1] : vector<16x128xf32> to vector<16xf32>
    %67 = vector.shape_cast %66 : vector<16xf32> to vector<16x1xf32>
    %cst_24 = arith.constant 2.000000e+00 : f32
    %68 = vector.broadcast %cst_24 : f32 to vector<16x1xf32>
    %69 = arith.mulf %68, %67 : vector<16x1xf32>
    %cst_25 = arith.constant 1.000000e+00 : f32
    %70 = vector.broadcast %cst_25 : f32 to vector<16x1xf32>
    %71 = arith.addf %70, %69 : vector<16x1xf32>
    %cst_26 = arith.constant 1.000000e+00 : f32
    %72 = vector.broadcast %cst_26 : f32 to vector<1x1xf32>
    %73 = arith.mulf %72, %63 : vector<1x1xf32>
    %74 = vector.broadcast %73 : vector<1x1xf32> to vector<16x1xf32>
    %75 = arith.addf %71, %74 : vector<16x1xf32>
    %76 = vector.broadcast %75 : vector<16x1xf32> to vector<16x128xf32>
    %77 = arith.mulf %76, %41 : vector<16x128xf32>
    %cst_27 = arith.constant 1.000000e+00 : f32
    %78 = vector.broadcast %cst_27 : f32 to vector<16x1xf32>
    %79 = arith.mulf %78, %60 : vector<16x1xf32>
    %cst_28 = arith.constant 1.000000e+00 : f32
    %80 = vector.broadcast %cst_28 : f32 to vector<16x1xf32>
    %81 = arith.subf %80, %79 : vector<16x1xf32>
    %82 = vector.broadcast %81 : vector<16x1xf32> to vector<16x128xf32>
    %83 = vector.broadcast %57 : vector<1x128xf32> to vector<16x128xf32>
    %84 = arith.mulf %82, %83 : vector<16x128xf32>
    %85 = arith.addf %77, %84 : vector<16x128xf32>
    %cst_29 = arith.constant 2.000000e+00 : f32
    %86 = vector.broadcast %cst_29 : f32 to vector<16x1xf32>
    %87 = arith.mulf %86, %67 : vector<16x1xf32>
    %cst_30 = arith.constant 1.000000e+00 : f32
    %88 = vector.broadcast %cst_30 : f32 to vector<16x1xf32>
    %89 = arith.addf %88, %87 : vector<16x1xf32>
    %cst_31 = arith.constant 1.000000e+00 : f32
    %90 = vector.broadcast %cst_31 : f32 to vector<16x1xf32>
    %91 = arith.mulf %90, %60 : vector<16x1xf32>
    %92 = vector.broadcast %63 : vector<1x1xf32> to vector<16x1xf32>
    %93 = arith.mulf %91, %92 : vector<16x1xf32>
    %94 = arith.addf %89, %93 : vector<16x1xf32>
    %cst_32 = arith.constant 1.000000e-15 : f32
    %95 = vector.broadcast %cst_32 : f32 to vector<16x1xf32>
    %96 = arith.maximumf %94, %95 : vector<16x1xf32>
    %97 = vector.broadcast %96 : vector<16x1xf32> to vector<16x128xf32>
    %98 = arith.divf %85, %97 : vector<16x128xf32>
    %99 = arith.mulf %98, %98 : vector<16x128xf32>
    %cst_33 = arith.constant dense<0.000000e+00> : vector<16xf32>
    %100 = vector.multi_reduction <add>, %99, %cst_33 [1] : vector<16x128xf32> to vector<16xf32>
    %101 = vector.shape_cast %100 : vector<16xf32> to vector<16x1xf32>
    %cst_34 = arith.constant 1.000000e-30 : f32
    %102 = vector.broadcast %cst_34 : f32 to vector<16x1xf32>
    %103 = arith.maximumf %101, %102 : vector<16x1xf32>
    %104 = math.sqrt %103 : vector<16x1xf32>
    %cst_35 = arith.constant 0.999989986 : f32
    %105 = vector.broadcast %cst_35 : f32 to vector<16x1xf32>
    %106 = arith.cmpf ogt, %104, %105 : vector<16x1xf32>
    %107 = vector.broadcast %104 : vector<16x1xf32> to vector<16x128xf32>
    %108 = arith.divf %98, %107 : vector<16x128xf32>
    %cst_36 = arith.constant 0.999989986 : f32
    %109 = vector.broadcast %cst_36 : f32 to vector<16x128xf32>
    %110 = arith.mulf %108, %109 : vector<16x128xf32>
    %111 = vector.shape_cast %106 : vector<16x1xi1> to vector<16x1xi1>
    %112 = vector.broadcast %111 : vector<16x1xi1> to vector<16x128xi1>
    %113 = arith.select %112, %110, %98 : vector<16x128xi1>, vector<16x128xf32>
    %c0_37 = arith.constant 0 : index
    %c0_38 = arith.constant 0 : index
    %114 = vector.load %arg4[%c0_37, %c0_38] : memref<16x128xf32, #tpu.memory_space<vmem>>, vector<16x128xf32>
    tpu.vector_store %arg4[%c0_37, %c0_38], %113 {strides = array<i32>} : memref<16x128xf32, #tpu.memory_space<vmem>>, vector<16x128xf32>,
    return
  }
  func.func @transform_0(%arg0: i32) -> (i32, i32) {
    %c0_i32 = arith.constant 0 : i32
    %c0_i32_0 = arith.constant 0 : i32
    return %arg0, %c0_i32 : i32, i32
  }
  func.func @transform_1(%arg0: i32) -> (i32, i32) {
    %c0_i32 = arith.constant 0 : i32
    %c0_i32_0 = arith.constant 0 : i32
    %c0_i32_1 = arith.constant 0 : i32
    return %c0_i32, %c0_i32_0 : i32, i32
  }
  func.func @transform_2(%arg0: i32) -> (i32, i32) {
    %c0_i32 = arith.constant 0 : i32
    %c0_i32_0 = arith.constant 0 : i32
    %c0_i32_1 = arith.constant 0 : i32
    return %c0_i32, %c0_i32_0 : i32, i32
  }
  func.func @transform_3(%arg0: i32) -> (i32, i32) {
    %c0_i32 = arith.constant 0 : i32
    %c0_i32_0 = arith.constant 0 : i32
    return %arg0, %c0_i32 : i32, i32
  }
}

</mosaic_0001>

<bundles_post_ra>
// kernel: tpu_custom_call.1
= control target key start
LH: loop header
LB: loop body
LE: loop exit
PB: predicated region body
PF: predicated region fallthrough
CT: control target
= control target key end

     0   :  { %8 = vsyncpa [#allocation3], 0  ;;  %s638_s0 = inlined_call_operand.hbm [shape: f32[16,128], index: 0, kind: input, shape index: {}]   ;;  %s639_s1 = inlined_call_operand.hbm [shape: f32[128,128], index: 1, kind: input, shape index: {}]   ;;  %s640_s2 = inlined_call_operand.vmem [shape: f32[1,128], index: 2, kind: input, shape index: {}]   ;;  %s641_s3 = inlined_call_operand.hbm [shape: f32[16,128], index: 3, kind: output, shape index: {}]  }
   0x1   :  { %9 = vsyncpa [#allocation6], 0 }
   0x2   :  { %10 = vsyncpa [#allocation4], 0  ;;  %s548_s12 = smov [#allocation2]   ;;  %s476_s16 = scalar_lea.hbm %s638_s0, 256 }
   0x3   :  { %s16_s13 = sshll.u32 %s548_s12, 4  ;;  %p477_p0 = scmp.ne.s32.totalorder %s638_s0, %s476_s16  ;;  %s17_s13 = int_to_ptr.vmem [resolvable:$true] %s16_s13 }
   0x4   :  { %p480_p1 = scmp.lt.u32.totalorder %s476_s16, %s638_s0 }
   0x6   :  { %p482_p2 = pnand %p480_p1, %p477_p0 }
   0x8   :  { %485 = shalt.err (!%p482_p2)
}
   0x9   :  { %s486_s21 = scalar_lea.vmem %s17_s13, 256  ;;  %p491_p4 = scmp.lt.s32.totalorder %s17_s13, %s17_s13 }
   0xa   :  { %p487_p3 = scmp.ne.s32.totalorder %s17_s13, %s486_s21  ;;  %p492_p5 = scmp.lt.s32.totalorder %s486_s21, %s486_s21 }
   0xc   :  { %p493_p6 = por %p492_p5, %p491_p4 }
   0xe   :  { %p494_p7 = pnand %p493_p6, %p487_p3 }
  0x10   :  { %497 = shalt.err (!%p494_p7)
}
  0x11   :  { %s549_s22 = smov 128   ;;  %s550_s23 = smov 8  }
  0x12   :  { %22 = dma.hbm_to_vmem [thread:$0]  %s638_s0, 256, %s17_s13, [#allocation3], %s549_s22, %s549_s22, %s550_s23  }
  0x13   :  { %s551_s26 = smov [#allocation5]   ;;  %s498_s30 = scalar_lea.hbm %s639_s1, 2048 }
  0x14   :  { %s28_s27 = sshll.u32 %s551_s26, 4  ;;  %p499_p8 = scmp.ne.s32.totalorder %s639_s1, %s498_s30  ;;  %s29_s27 = int_to_ptr.vmem [resolvable:$true] %s28_s27 }
  0x15   :  { %p502_p9 = scmp.lt.u32.totalorder %s498_s30, %s639_s1 }
  0x17   :  { %p504_p10 = pnand %p502_p9, %p499_p8 }
  0x19   :  { %507 = shalt.err (!%p504_p10)
}
  0x1a   :  { %s508_s8 = scalar_lea.vmem %s29_s27, 2048  ;;  %p513_p12 = scmp.lt.s32.totalorder %s29_s27, %s29_s27 }
  0x1b   :  { %p509_p11 = scmp.ne.s32.totalorder %s29_s27, %s508_s8  ;;  %p514_p13 = scmp.lt.s32.totalorder %s508_s8, %s508_s8 }
  0x1d   :  { %p515_p0 = por %p514_p13, %p513_p12 }
  0x1f   :  { %p516_p1 = pnand %p515_p0, %p509_p11 }
  0x21   :  { %519 = shalt.err (!%p516_p1)
}
  0x22   :  { %34 = dma.hbm_to_vmem [thread:$0]  %s639_s1, 2048, %s29_s27, [#allocation6], %s549_s22, %s549_s22, %s550_s23  }
  0x23   :  { %542 = dma.done.wait [#allocation3], 256  }
  0x24   :  { %543 = vsyncadd [#allocation3], 4294967040 }
  0x25   :  { %544 = dma.done.wait [#allocation6], 2048  }
  0x26   :  { %545 = vsyncadd [#allocation6], 4294965248  ;;  %v45_v0 = vld [vmem:[#allocation5] sm:$0xff]  ;;  %v46_v1 = vld [vmem:[#allocation5 + $0x8] sm:$0xff]  ;;  %vm220_vm0 = vcmask 1040384  }
  0x27   :  { %v47_v2 = vld [vmem:[#allocation5 + $0x10] sm:$0xff]  ;;  %v393_v3 = vpack.c.bf16 %v46_v1, %v45_v0  ;;  %v48_v4 = vld [vmem:[#allocation5 + $0x18] sm:$0xff]  ;;  %v49_v6 = vld [vmem:[#allocation5 + $0x20] sm:$0xff] }
  0x28   :  { %v397_v5 = vpack.c.bf16 %v48_v4, %v47_v2  ;;  %v50_v7 = vld [vmem:[#allocation5 + $0x28] sm:$0xff]  ;;  %v43_v9 = vld [vmem:[#allocation2] sm:$0xff]  ;;  %v52_v11 = vld [vmem:[#allocation5 + $0x38] sm:$0xff] }
  0x29   :  { %394 = vmatprep.subr.bf16.mxu0 %v393_v3  ;;  %v401_v8 = vpack.c.bf16 %v50_v7, %v49_v6  ;;  %v51_v10 = vld [vmem:[#allocation5 + $0x30] sm:$0xff]  ;;  %390 = vmatprep.mubr.f32.mxu0 %v43_v9  ;;  %v136_v12 = vmul.f32 %v43_v9, %v43_v9  ;;  %v44_v14 = vld [vmem:[#allocation2 + $0x8] sm:$0xff]  ;;  %v53_v18 = vld [vmem:[#allocation5 + $0x40] sm:$0xff] }
  0x2a   :  { %396 = vmatpush3.bf16.msra.mxu0 %v393_v3  ;;  %v218_v13 = vld [vmem:[%s640_s2] sm:$0x1]  ;;  %v137_v15 = vmul.f32 %v44_v14, %v44_v14  ;;  %v405_v16 = vpack.c.bf16 %v52_v11, %v51_v10  ;;  %v54_v19 = vld [vmem:[#allocation5 + $0x48] sm:$0xff]  ;;  %v56_v23 = vld [vmem:[#allocation5 + $0x58] sm:$0xff]  ;;  %s552_s2 = smov [#allocation7]  }
  0x2b   :  { %398 = vmatprep.subr.bf16.mxu0 %v397_v5  ;;  %138 = vadd.xlane.f32.xlu0 %v136_v12  ;;  %v219_v17 = vmul.f32 %v218_v13, %v218_v13  ;;  %v409_v20 = vpack.c.bf16 %v54_v19, %v53_v18  ;;  %v55_v22 = vld [vmem:[#allocation5 + $0x50] sm:$0xff]  ;;  %v57_v25 = vld [vmem:[#allocation5 + $0x60] sm:$0xff]  ;;  %v58_v26 = vld [vmem:[#allocation5 + $0x68] sm:$0xff]  ;;  %s327_s11 = sshll.u32 %s552_s2, 4  ;;  %s328_s11 = int_to_ptr.vmem [resolvable:$true] %s327_s11 }
  0x2c   :  { %v413_v24 = vpack.c.bf16 %v56_v23, %v55_v22  ;;  %v417_v27 = vpack.c.bf16 %v58_v26, %v57_v25  ;;  %v59_v28 = vld [vmem:[#allocation5 + $0x70] sm:$0xff]  ;;  %v60_v29 = vld [vmem:[#allocation5 + $0x78] sm:$0xff]  ;;  %s520_s12 = scalar_lea.vmem %s328_s11, 256  ;;  %p525_p3 = scmp.lt.s32.totalorder %s328_s11, %s328_s11 }
  0x2d   :  { %v221_v21 = vsel %vm220_vm0, %v219_v17, 0.0  ;;  %v421_v30 = vpack.c.bf16 %v60_v29, %v59_v28  ;;  %p521_p2 = scmp.ne.s32.totalorder %s328_s11, %s520_s12  ;;  %p526_p4 = scmp.lt.s32.totalorder %s520_s12, %s520_s12 }
  0x2e   :  { %400 = vmatpush3.bf16.msra.mxu0 %v397_v5 }
  0x2f   :  { %402 = vmatprep.subr.bf16.mxu0 %v401_v8  ;;  %140 = vadd.xlane.f32.xlu0 %v137_v15  ;;  %p527_p5 = por %p526_p4, %p525_p3 }
  0x31   :  { %p528_p6 = pnand %p527_p5, %p521_p2 }
  0x32   :  { %404 = vmatpush3.bf16.msra.mxu0 %v401_v8 }
  0x33   :  { %406 = vmatprep.subr.bf16.mxu0 %v405_v16  ;;  %222 = vadd.xlane.f32.xlu0 %v221_v21 }
  0x36   :  { %408 = vmatpush3.bf16.msra.mxu0 %v405_v16 }
  0x37   :  { %410 = vmatprep.subr.bf16.mxu0 %v409_v20 }
  0x3a   :  { %412 = vmatpush3.bf16.msra.mxu0 %v409_v20 }
  0x3b   :  { %414 = vmatprep.subr.bf16.mxu0 %v413_v24 }
  0x3e   :  { %416 = vmatpush3.bf16.msra.mxu0 %v413_v24 }
  0x3f   :  { %418 = vmatprep.subr.bf16.mxu0 %v417_v27 }
  0x42   :  { %420 = vmatpush3.bf16.msra.mxu0 %v417_v27 }
  0x43   :  { %422 = vmatprep.subr.bf16.mxu0 %v421_v30 }
  0x46   :  { %424 = vmatpush3.bf16.msra.mxu0 %v421_v30 }
  0x49   :  { %391 = vmatmul.mubr.f32.vlgmr.msra.gmra.mrb[0].mxu0 %v44_v14 }
  0xb8   :  { %v139_v31 = vpop.xlane.xlu0 %138 }
  0xb9   :  { %v142_v50 = vmax.f32 %v139_v31, 1e-30 }
  0xbb   :  { %vm146_vm3 = vcmp.eq.f32.partialorder %v142_v50, inf  ;;  %v149_v55 = vand.u32 2147483648, %v142_v50  ;;  %vm148_vm4 = vcmp.eq.f32.partialorder %v142_v50, 0.0 }
  0xbc   :  { %v141_v32 = vpop.xlane.xlu0 %140 }
  0xbd   :  { %v143_v51 = vmax.f32 %v141_v32, 1e-30 }
  0xbf   :  { %vm153_vm5 = vcmp.eq.f32.partialorder %v143_v51, inf  ;;  %v156_v59 = vand.u32 2147483648, %v143_v51  ;;  %vm155_vm6 = vcmp.eq.f32.partialorder %v143_v51, 0.0 }
  0xc0   :  { %v223_v33 = vpop.xlane.xlu0 %222 }
  0xc1   :  { %v224_v35 = vmax.f32 %v223_v33, 1e-30 }
  0xc3   :  { %430 = vrsqrt.f32 %v224_v35  ;;  %vm227_vm1 = vcmp.eq.f32.partialorder %v224_v35, inf  ;;  %v230_v41 = vand.u32 2147483648, %v224_v35  ;;  %vm229_vm2 = vcmp.eq.f32.partialorder %v224_v35, 0.0 }
  0xcd   :  { %v431_v39 = vpop.eup %430 }
  0xce   :  { %v226_v40 = vmul.f32 %v431_v39, %v224_v35 }
  0xd0   :  { %v228_v42 = vsel %vm227_vm1, %v224_v35, %v226_v40  ;;  %v246_v35 = vlaneseq }
  0xd1   :  { %v231_v43 = vsel %vm229_vm2, %v230_v41, %v228_v42 }
  0xd2   :  { %432 = vtanh.f32 %v231_v43 }
  0xd3   :  { %434 = vrcp.f32 %v231_v43 }
  0xd4   :  { %436 = vrsqrt.f32 %v142_v50 }
  0xd5   :  { %438 = vrsqrt.f32 %v143_v51 }
  0xdc   :  { %v433_v44 = vpop.eup %432 }
  0xdd   :  { %v233_v45 = vmul.f32 %v433_v44, %v218_v13  ;;  %v435_v46 = vpop.eup %434 }
  0xde   :  { %v437_v52 = vpop.eup %436 }
  0xdf   :  { %v615_v47 = vmul.f32 %v435_v46, %v233_v45  ;;  %v145_v53 = vmul.f32 %v437_v52, %v142_v50  ;;  %v439_v54 = vpop.eup %438 }
  0xe0   :  { %v152_v57 = vmul.f32 %v439_v54, %v143_v51 }
  0xe1   :  { %v242_v48 = vmul.f32 %v615_v47, %v615_v47  ;;  %v147_v56 = vsel %vm146_vm3, %v142_v50, %v145_v53 }
  0xe2   :  { %v150_v58 = vsel %vm148_vm4, %v149_v55, %v147_v56  ;;  %v154_v60 = vsel %vm153_vm5, %v143_v51, %v152_v57 }
  0xe3   :  { %v243_v49 = vsel %vm220_vm0, %v242_v48, 0.0  ;;  %v180_v61 = vmin.f32 %v150_v58, 0.9999999  ;;  %v157_v62 = vsel %vm155_vm6, %v156_v59, %v154_v60 }
  0xe4   :  { %v181_v0 = vmin.f32 %v157_v62, 0.9999999 }
  0xe5   :  { %v184_v63 = vsub.f32 1.0, %v180_v61  ;;  %v182_v2 = vadd.f32 1.0, %v180_v61 }
  0xe6   :  { %v185_v1 = vsub.f32 1.0, %v181_v0  ;;  %v183_v4 = vadd.f32 1.0, %v181_v0 }
  0xe7   :  { %440 = vrcp.f32 %v184_v63 }
  0xe8   :  { %442 = vrcp.f32 %v185_v1 }
  0xf1   :  { %v441_v3 = vpop.eup %440 }
  0xf2   :  { %v187_v5 = vmul.f32 %v441_v3, %v182_v2  ;;  %v443_v6 = vpop.eup %442 }
  0xf3   :  { %v189_v9 = vmul.f32 %v443_v6, %v183_v4 }
  0xf4   :  { %444 = vlog2.f32 %v187_v5 }
  0xfe   :  { %v445_v12 = vpop.eup %444 }
  0xff   :  { %v191_v14 = vmul.f32 0.6931472, %v445_v12 }
 0x101   :  { %v194_v22 = vmul.f32 0.5, %v191_v14 }
 0x11c   :  { %v607_v34 = vpop.f32.mrb[0].mxu0 }
 0x11d   :  { %v609_v36 = vpop.f32.mrb[1].mxu0  ;;  %v159_v38 = vmul.f32 %v607_v34, %v607_v34 }
 0x11e   :  { %v158_v37 = vmul.f32 %v609_v36, %v609_v36 }
 0x120   :  { %160 = vadd.xlane.f32.xlu1 %v158_v37  ;;  %v247_v37 = vshrl.u32 %v246_v35, 7 }
 0x122   :  { %v248_v39 = vsub.s32 0, %v247_v37 }
 0x124   :  { %162 = vadd.xlane.f32.xlu1 %v159_v38  ;;  %v249_v44 = vrot.slane %v615_v47, %v248_v39 }
 0x128   :  { %244 = vadd.xlane.f32.xlu1 %v243_v49 }
 0x1ad   :  { %v161_v7 = vpop.xlane.xlu1 %160 }
 0x1ae   :  { %v164_v8 = vmax.f32 %v161_v7, 1e-30  ;;  %vm210_vm11 = vcmp.eq.f32.partialorder %v161_v7, 0.0 }
 0x1b0   :  { %446 = vrsqrt.f32 %v164_v8  ;;  %vm168_vm7 = vcmp.eq.f32.partialorder %v164_v8, inf  ;;  %v171_v17 = vand.u32 2147483648, %v164_v8  ;;  %vm170_vm8 = vcmp.eq.f32.partialorder %v164_v8, 0.0 }
 0x1b1   :  { %v163_v10 = vpop.xlane.xlu1 %162  ;;  %448 = vlog2.f32 %v189_v9 }
 0x1b2   :  { %v165_v11 = vmax.f32 %v163_v10, 1e-30  ;;  %450 = vrcp.f32 %v150_v58  ;;  %vm211_vm12 = vcmp.eq.f32.partialorder %v163_v10, 0.0 }
 0x1b4   :  { %452 = vrsqrt.f32 %v165_v11  ;;  %vm175_vm9 = vcmp.eq.f32.partialorder %v165_v11, inf  ;;  %v178_v26 = vand.u32 2147483648, %v165_v11  ;;  %vm177_vm10 = vcmp.eq.f32.partialorder %v165_v11, 0.0 }
 0x1b5   :  { %454 = vrcp.f32 %v157_v62  ;;  %v245_v54 = vpop.xlane.xlu1 %244 }
 0x1b6   :  { %v263_v57 = vrot.slane %v245_v54, %v248_v39 }
 0x1ba   :  { %v447_v13 = vpop.eup %446 }
 0x1bb   :  { %v167_v15 = vmul.f32 %v447_v13, %v164_v8  ;;  %v449_v16 = vpop.eup %448 }
 0x1bc   :  { %v451_v18 = vpop.eup %450  ;;  %v193_v24 = vmul.f32 0.6931472, %v449_v16 }
 0x1bd   :  { %v169_v19 = vsel %vm168_vm7, %v164_v8, %v167_v15 }
 0x1be   :  { %v453_v20 = vpop.eup %452  ;;  %v172_v21 = vsel %vm170_vm8, %v171_v17, %v169_v19  ;;  %v195_v31 = vmul.f32 0.5, %v193_v24 }
 0x1bf   :  { %v197_v23 = vmul.f32 %v451_v18, %v172_v21  ;;  %v174_v25 = vmul.f32 %v453_v20, %v165_v11  ;;  %v455_v29 = vpop.eup %454 }
 0x1c1   :  { %v200_v27 = vmul.f32 %v197_v23, %v194_v22  ;;  %v176_v28 = vsel %vm175_vm9, %v165_v11, %v174_v25 }
 0x1c2   :  { %v179_v30 = vsel %vm177_vm10, %v178_v26, %v176_v28 }
 0x1c3   :  { %456 = vtanh.f32 %v200_v27  ;;  %v199_v32 = vmul.f32 %v455_v29, %v179_v30 }
 0x1c4   :  { %458 = vrcp.f32 %v172_v21 }
 0x1c5   :  { %v201_v33 = vmul.f32 %v199_v32, %v195_v31 }
 0x1c7   :  { %460 = vtanh.f32 %v201_v33 }
 0x1c8   :  { %462 = vrcp.f32 %v179_v30 }
 0x1cd   :  { %v457_v38 = vpop.eup %456 }
 0x1ce   :  { %v204_v40 = vmul.f32 %v457_v38, %v609_v36  ;;  %v459_v41 = vpop.eup %458 }
 0x1d0   :  { %v207_v42 = vmul.f32 %v459_v41, %v204_v40 }
 0x1d1   :  { %v461_v43 = vpop.eup %460 }
 0x1d2   :  { %v216_v45 = vsel %vm210_vm11, 0.0, %v207_v42  ;;  %v205_v46 = vmul.f32 %v461_v43, %v607_v34  ;;  %v463_v48 = vpop.eup %462 }
 0x1d3   :  { %v250_v49 = vmul.f32 %v249_v44, %v216_v45  ;;  %v236_v52 = vmul.f32 %v216_v45, %v216_v45 }
 0x1d4   :  { %v209_v50 = vmul.f32 %v463_v48, %v205_v46 }
 0x1d5   :  { %252 = vadd.xlane.f32.xlu0 %v250_v49 }
 0x1d6   :  { %v217_v51 = vsel %vm211_vm12, 0.0, %v209_v50 }
 0x1d7   :  { %v251_v53 = vmul.f32 %v249_v44, %v217_v51  ;;  %v237_v36 = vmul.f32 %v217_v51, %v217_v51 }
 0x1d9   :  { %238 = vadd.xlane.f32.xlu0 %v236_v52  ;;  %254 = vadd.xlane.f32.xlu1 %v251_v53 }
 0x1dd   :  { %240 = vadd.xlane.f32.xlu1 %v237_v36 }
 0x262   :  { %v253_v55 = vpop.xlane.xlu0 %252 }
 0x263   :  { %v256_v56 = vmul.f32 2.0, %v253_v55 }
 0x265   :  { %v258_v59 = vadd.f32 1.0, %v256_v56 }
 0x266   :  { %v239_v47 = vpop.xlane.xlu0 %238  ;;  %v255_v58 = vpop.xlane.xlu1 %254 }
 0x267   :  { %v274_v34 = vmul.f32 %v263_v57, %v239_v47  ;;  %v257_v60 = vmul.f32 2.0, %v255_v58  ;;  %v264_v2 = vadd.f32 %v263_v57, %v258_v59  ;;  %v268_v3 = vsub.f32 1.0, %v239_v47 }
 0x269   :  { %v276_v61 = vadd.f32 %v274_v34, %v258_v59  ;;  %v259_v0 = vadd.f32 1.0, %v257_v60  ;;  %v266_v6 = vmul.f32 %v264_v2, %v216_v45  ;;  %v270_v7 = vmul.f32 %v268_v3, %v249_v44 }
 0x26a   :  { %v241_v62 = vpop.xlane.xlu1 %240 }
 0x26b   :  { %v278_v63 = vmax.f32 %v276_v61, 1e-15  ;;  %v275_v1 = vmul.f32 %v263_v57, %v241_v62  ;;  %v265_v8 = vadd.f32 %v263_v57, %v259_v0  ;;  %v269_v9 = vsub.f32 1.0, %v241_v62 }
 0x26c   :  { %v272_v10 = vadd.f32 %v270_v7, %v266_v6 }
 0x26d   :  { %464 = vrcp.f32 %v278_v63  ;;  %v277_v4 = vadd.f32 %v275_v1, %v259_v0  ;;  %v267_v12 = vmul.f32 %v265_v8, %v217_v51  ;;  %v271_v13 = vmul.f32 %v269_v9, %v249_v44 }
 0x26f   :  { %v279_v5 = vmax.f32 %v277_v4, 1e-15  ;;  %v273_v16 = vadd.f32 %v271_v13, %v267_v12 }
 0x271   :  { %466 = vrcp.f32 %v279_v5 }
 0x277   :  { %v465_v11 = vpop.eup %464 }
 0x278   :  { %v281_v14 = vmul.f32 %v465_v11, %v272_v10 }
 0x27a   :  { %v284_v15 = vmul.f32 %v281_v14, %v281_v14 }
 0x27b   :  { %v467_v17 = vpop.eup %466 }
 0x27c   :  { %286 = vadd.xlane.f32.xlu0 %v284_v15  ;;  %v283_v18 = vmul.f32 %v467_v17, %v273_v16 }
 0x27e   :  { %v285_v19 = vmul.f32 %v283_v18, %v283_v18 }
 0x280   :  { %288 = vadd.xlane.f32.xlu1 %v285_v19 }
 0x309   :  { %v287_v20 = vpop.xlane.xlu0 %286 }
 0x30a   :  { %v290_v21 = vmax.f32 %v287_v20, 1e-30 }
 0x30c   :  { %468 = vrsqrt.f32 %v290_v21  ;;  %vm294_vm13 = vcmp.eq.f32.partialorder %v290_v21, inf  ;;  %v297_v26 = vand.u32 2147483648, %v290_v21  ;;  %vm296_vm14 = vcmp.eq.f32.partialorder %v290_v21, 0.0 }
 0x30d   :  { %v289_v22 = vpop.xlane.xlu1 %288 }
 0x30e   :  { %v291_v23 = vmax.f32 %v289_v22, 1e-30 }
 0x310   :  { %470 = vrsqrt.f32 %v291_v23  ;;  %vm301_vm15 = vcmp.eq.f32.partialorder %v291_v23, inf  ;;  %v304_v31 = vand.u32 2147483648, %v291_v23  ;;  %vm303_vm0 = vcmp.eq.f32.partialorder %v291_v23, 0.0 }
 0x316   :  { %v469_v24 = vpop.eup %468 }
 0x317   :  { %v293_v25 = vmul.f32 %v469_v24, %v290_v21 }
 0x319   :  { %v295_v27 = vsel %vm294_vm13, %v290_v21, %v293_v25 }
 0x31a   :  { %v298_v28 = vsel %vm296_vm14, %v297_v26, %v295_v27  ;;  %v471_v29 = vpop.eup %470 }
 0x31b   :  { %472 = vrcp.f32 %v298_v28  ;;  %v300_v30 = vmul.f32 %v471_v29, %v291_v23  ;;  %vm306_vm1 = vcmp.gt.f32.partialorder %v298_v28, 0.99999 }
 0x31d   :  { %v302_v32 = vsel %vm301_vm15, %v291_v23, %v300_v30 }
 0x31e   :  { %v305_v33 = vsel %vm303_vm0, %v304_v31, %v302_v32 }
 0x31f   :  { %474 = vrcp.f32 %v305_v33  ;;  %vm307_vm2 = vcmp.gt.f32.partialorder %v305_v33, 0.99999 }
 0x325   :  { %v473_v35 = vpop.eup %472 }
 0x326   :  { %v309_v37 = vmul.f32 %v473_v35, %v281_v14 }
 0x328   :  { %v312_v38 = vmul.f32 0.99999, %v309_v37 }
 0x329   :  { %v475_v39 = vpop.eup %474 }
 0x32a   :  { %v318_v40 = vsel %vm306_vm1, %v312_v38, %v281_v14  ;;  %v311_v41 = vmul.f32 %v475_v39, %v283_v18 }
 0x32b   :  { %320 = vst [vmem:[#allocation7] sm:$0xff] %v318_v40 }
 0x32c   :  { %v313_v42 = vmul.f32 0.99999, %v311_v41 }
 0x32e   :  { %v319_v43 = vsel %vm307_vm2, %v313_v42, %v283_v18 }
 0x32f   :  { %321 = vst [vmem:[#allocation7 + $0x8] sm:$0xff] %v319_v43 }
 0x330   :  { %531 = shalt.err (!%p528_p6)
}
 0x331   :  { %s532_s15 = scalar_lea.hbm %s641_s3, 256 }
 0x332   :  { %p533_p7 = scmp.ne.s32.totalorder %s641_s3, %s532_s15  ;;  %p536_p8 = scmp.lt.u32.totalorder %s532_s15, %s641_s3 }
 0x334   :  { %p538_p9 = pnand %p536_p8, %p533_p7 }
 0x336   :  { %541 = shalt.err (!%p538_p9)
}
 0x337   :  { %333 = dma.vmem_to_hbm [thread:$0]  %s328_s11, 256, %s641_s3, [#allocation4], %s549_s22, %s549_s22, %s550_s23  }
 0x338   :  { %546 = dma.done.wait [#allocation4], 256  }
 0x339   :  { %547 = vsyncadd [#allocation4], 4294967040 }
 0x33a   :  { %337 = vsyncpa [#allocation3], 1 }
 0x33b   :  { %338 = vsyncpa [#allocation6], 1 }
 0x33c   :  { %339 = vsyncpa [#allocation4], 1 }

</bundles_post_ra>
